<compile_context>
chip_gen: v7x
topology: tpu7x:2x2x1
jax: 0.10.0
libtpu: 0.0.40
codegen_flags: <defaults>
</compile_context>

<pallas_src>
import functools

import jax
import jax.numpy as jnp
from jax.experimental import pallas as pl
from jax.experimental.pallas import tpu as pltpu


# ---------------------------------------------------------------------------
# Pallas kernel: fused  y = patches @ [Wc | Wg] + [bc | bg]
#                       out = LeakyReLU(y[:, :OCp]) * Sigmoid(y[:, OCp:])
#                (or     out = y                     when activation=False)
# ---------------------------------------------------------------------------
def _gated_conv_kernel(p_ref, w_ref, b_ref, o_ref, *,
                       ocp, activation, negative_slope):
    p = p_ref[...]                                          # (TM, K)

    # Single MXU pass over the fused RHS; accumulate in f32.
    y = jnp.dot(p, w_ref[...], preferred_element_type=jnp.float32)
    y = y + b_ref[...]                                      # (1, W) broadcasts

    if activation:
        conv = y[:, :ocp]                                   # lane-aligned split
        gate = y[:, ocp:]
        # LeakyReLU (PyTorch default negative_slope = 0.01) on VPU
        conv = jnp.where(conv >= 0, conv, negative_slope * conv)
        out = conv * jax.nn.sigmoid(gate)                   # sigmoid on EUP
    else:
        out = y                                             # plain conv path

    o_ref[...] = out.astype(o_ref.dtype)


# ---------------------------------------------------------------------------
# JAX-side glue
# ---------------------------------------------------------------------------
def _im2col(x_padded, kh, kw, stride):
    """x_padded: (N, C, Hp, Wp) -> patches (N*OH*OW, C*KH*KW)."""
    n, c, hp, wp = x_padded.shape
    oh = (hp - kh) // stride + 1
    ow = (wp - kw) // stride + 1
    cols = []
    for i in range(kh):
        for j in range(kw):
            sl = x_padded[:, :, i:i + (oh - 1) * stride + 1:stride,
                                j:j + (ow - 1) * stride + 1:stride]
            cols.append(sl)                                 # (N, C, OH, OW)
    # (N, C, KH*KW, OH, OW) -> (N, OH, OW, C, KH*KW) -> (M, K)  (C-major order,
    # matching w.reshape(OC, C*KH*KW))
    patches = jnp.stack(cols, axis=2)
    patches = patches.transpose(0, 3, 4, 1, 2).reshape(n * oh * ow, c * kh * kw)
    return patches, oh, ow


def _round_up(a, b):
    return (a + b - 1) // b * b


def _choose_tm(m):
    # Amortize the ~0.35us per-grid-step overhead with a big tile, but keep at
    # least 2 grid steps where possible so v7x's two TensorCores both get work
    # on the "parallel" M axis (neutral on 1-TC v5e/v6e).
    tm = 1024
    while tm > 128 and m <= tm:
        tm //= 2
    return tm


def gated_conv2d(x, w_conv, b_conv, w_gate, b_gate, *,
                 stride=1, padding=0, activation=True,
                 negative_slope=0.01, tm=None, channels_last=False,
                 compute_dtype=None):
    """x: (N, C, H, W) float32; weights: (OC, C, KH, KW); biases: (OC,)."""
    n, c, h, w = x.shape
    oc, _, kh, kw = w_conv.shape
    k = c * kh * kw
    # TODO(synk): dilation != 1 and groups != 1 are not implemented.

    # replicate padding (PyTorch F.pad mode='replicate')
    p = padding
    x_pad = jnp.pad(x, ((0, 0), (0, 0), (p, p), (p, p)), mode="edge")

    # TODO(synk): im2col stays as JAX glue (fused by XLA under jit into one
    # producer of the (M, K) matrix).  Fusing the patch gather into the kernel
    # (halo row-tiles) would cut HBM traffic a further ~KH*KW x for big images.
    patches, oh, ow = _im2col(x_pad, kh, kw, stride)        # (M, K)
    m = patches.shape[0]

    tile_m = tm if tm is not None else _choose_tm(m)
    grid_m = pl.cdiv(m, tile_m)
    m_pad = grid_m * tile_m
    if m_pad != m:
        patches = jnp.pad(patches, ((0, m_pad - m), (0, 0)))

    # Lane-dense fused weights: pad OC -> OCp (multiple of 128) and, when
    # gating, concatenate conv/gate into one (K, 2*OCp) RHS so the patches
    # tile goes through the MXU exactly once.
    ocp = _round_up(oc, 128)

    def prep_w(wm):
        return jnp.pad(wm.reshape(oc, k).T, ((0, 0), (0, ocp - oc)))

    def prep_b(bv):
        return jnp.pad(bv.reshape(1, oc), ((0, 0), (0, ocp - oc)))

    if activation:
        w_cat = jnp.concatenate([prep_w(w_conv), prep_w(w_gate)], axis=1)
        b_cat = jnp.concatenate([prep_b(b_conv), prep_b(b_gate)], axis=1)
    else:
        w_cat = prep_w(w_conv)
        b_cat = prep_b(b_conv)
    wcols = w_cat.shape[1]

    if compute_dtype is not None:
        # e.g. jnp.bfloat16 for full MXU rate on v6e/v7x (accum stays f32);
        # left off by default to match the fp32 PyTorch reference exactly.
        patches = patches.astype(compute_dtype)
        w_cat = w_cat.astype(compute_dtype)

    kernel = functools.partial(_gated_conv_kernel, ocp=ocp,
                               activation=activation,
                               negative_slope=negative_slope)

    # VMEM budget: patches/out tiles double-buffered; weights/bias have a
    # constant index_map (fetched once).  2x headroom on the estimate.
    # TODO(synk): for very large C/OC on v7x (64 MiB VMEM) add
    # pipeline_mode=pl.Buffered(1) on the weight/bias specs and a K-reduction
    # grid axis instead of holding the full (K, 2*OCp) RHS resident.
    esz = jnp.dtype(patches.dtype).itemsize
    needed = (2 * tile_m * k * esz + 2 * tile_m * ocp * 4
              + 2 * k * wcols * esz + 2 * wcols * 4)
    vmem_limit = int(min(100 * 2**20, max(8 * 2**20, 2 * needed)))

    out_flat = pl.pallas_call(
        kernel,
        out_shape=jax.ShapeDtypeStruct((m_pad, ocp), x.dtype),
        grid_spec=pltpu.PrefetchScalarGridSpec(
            num_scalar_prefetch=0,
            grid=(grid_m,),
            in_specs=[
                pl.BlockSpec((tile_m, k), lambda i: (i, 0)),   # patches tile
                pl.BlockSpec((k, wcols), lambda i: (0, 0)),    # fused weights
                pl.BlockSpec((1, wcols), lambda i: (0, 0)),    # fused bias
            ],
            out_specs=pl.BlockSpec((tile_m, ocp), lambda i: (i, 0)),
        ),
        compiler_params=pltpu.CompilerParams(
            dimension_semantics=("parallel",),
            vmem_limit_bytes=vmem_limit),
    )(patches, w_cat, b_cat)

    out = out_flat[:m, :oc].reshape(n, oh, ow, oc)           # NHWC
    if channels_last:
        return out
    # NCHW to match the PyTorch module (costs one extra HBM pass; pass
    # channels_last=True if the consumer can take NHWC).
    return out.transpose(0, 3, 1, 2)


if __name__ == "__main__":
    # Small, deterministic example consistent with the module:
    # GatedConv2d(in_channels=4, out_channels=8, kernel_size=3, padding=1)
    key = jax.random.PRNGKey(0)
    k_x, k_wc, k_bc, k_wg, k_bg = jax.random.split(key, 5)

    N, C, H, W = 2, 4, 16, 16
    OC, KH, KW = 8, 3, 3

    x = jax.random.normal(k_x, (N, C, H, W), dtype=jnp.float32)

    # TODO(synk): tl.init_weights is project-specific; using deterministic
    # small-normal init with the same parameter shapes instead.
    w_conv = 0.05 * jax.random.normal(k_wc, (OC, C, KH, KW), dtype=jnp.float32)
    b_conv = 0.05 * jax.random.normal(k_bc, (OC,), dtype=jnp.float32)
    w_gate = 0.05 * jax.random.normal(k_wg, (OC, C, KH, KW), dtype=jnp.float32)
    b_gate = 0.05 * jax.random.normal(k_bg, (OC,), dtype=jnp.float32)

    fwd = jax.jit(functools.partial(gated_conv2d, stride=1, padding=1,
                                    activation=True))
    out = fwd(x, w_conv, b_conv, w_gate, b_gate)
    jax.block_until_ready(out)
    assert out.shape == (N, OC, H, W), out.shape
    print("KERNEL_OK")
</pallas_src>

<mosaic_0001>
module attributes {stable_mosaic.version = 11 : i64} {
  func.func @_gated_conv_kernel(%arg0: i32, %arg1: memref<256x36xf32, #tpu.memory_space<vmem>>, %arg2: memref<36x256xf32, #tpu.memory_space<vmem>>, %arg3: memref<1x256xf32, #tpu.memory_space<vmem>>, %arg4: memref<256x128xf32, #tpu.memory_space<vmem>>) attributes {dimension_semantics = [#tpu.dimension_semantics<parallel>], iteration_bounds = array<i64: 2>, scalar_prefetch = 0 : i64, scratch_operands = 0 : i64, tpu.core_type = #tpu.core_type<tc>, window_params = [{transform_indices = @transform_0, window_bounds = array<i64: 256, 36>}, {pipeline_mode = #tpu.pipeline_mode<synchronous>, transform_indices = @transform_1, window_bounds = array<i64: 36, 256>}, {pipeline_mode = #tpu.pipeline_mode<synchronous>, transform_indices = @transform_2, window_bounds = array<i64: 1, 256>}, {transform_indices = @transform_3, window_bounds = array<i64: 256, 128>}]} {
    %c0 = arith.constant 0 : index
    %c0_0 = arith.constant 0 : index
    %0 = vector.load %arg1[%c0, %c0_0] : memref<256x36xf32, #tpu.memory_space<vmem>>, vector<256x36xf32>
    %c0_1 = arith.constant 0 : index
    %c0_2 = arith.constant 0 : index
    %1 = vector.load %arg2[%c0_1, %c0_2] : memref<36x256xf32, #tpu.memory_space<vmem>>, vector<36x256xf32>
    %cst = arith.constant dense<0.000000e+00> : vector<256x256xf32>
    %2 = tpu.matmul %0, %1, %cst {dimension_numbers = #tpu.dot_dimension_numbers<[1], [0], [0], [1], [0, 0, 1, 1], [], []>} : vector<256x36xf32>, vector<36x256xf32>, vector<256x256xf32> -> vector<256x256xf32>
    %c0_3 = arith.constant 0 : index
    %c0_4 = arith.constant 0 : index
    %3 = vector.load %arg3[%c0_3, %c0_4] : memref<1x256xf32, #tpu.memory_space<vmem>>, vector<1x256xf32>
    %4 = vector.broadcast %3 : vector<1x256xf32> to vector<256x256xf32>
    %5 = arith.addf %2, %4 : vector<256x256xf32>
    %6 = vector.extract_strided_slice %5 {offsets = [0, 0], sizes = [256, 128], strides = [1, 1]} : vector<256x256xf32> to vector<256x128xf32>
    %7 = vector.extract_strided_slice %5 {offsets = [0, 128], sizes = [256, 128], strides = [1, 1]} : vector<256x256xf32> to vector<256x128xf32>
    %cst_5 = arith.constant 0.000000e+00 : f32
    %8 = vector.broadcast %cst_5 : f32 to vector<256x128xf32>
    %9 = arith.cmpf oge, %6, %8 : vector<256x128xf32>
    %cst_6 = arith.constant 0.00999999977 : f32
    %10 = vector.broadcast %cst_6 : f32 to vector<256x128xf32>
    %11 = arith.mulf %10, %6 : vector<256x128xf32>
    %12 = arith.select %9, %6, %11 : vector<256x128xi1>, vector<256x128xf32>
    %13 = arith.negf %7 : vector<256x128xf32>
    %14 = math.exp %13 : vector<256x128xf32>
    %cst_7 = arith.constant 1.000000e+00 : f32
    %15 = vector.broadcast %cst_7 : f32 to vector<256x128xf32>
    %16 = arith.addf %15, %14 : vector<256x128xf32>
    %17 = arith.divf %15, %16 : vector<256x128xf32>
    %18 = arith.mulf %12, %17 : vector<256x128xf32>
    %c0_8 = arith.constant 0 : index
    %c0_9 = arith.constant 0 : index
    %19 = vector.load %arg4[%c0_8, %c0_9] : memref<256x128xf32, #tpu.memory_space<vmem>>, vector<256x128xf32>
    tpu.vector_store %arg4[%c0_8, %c0_9], %18 {strides = array<i32>} : memref<256x128xf32, #tpu.memory_space<vmem>>, vector<256x128xf32>,
    return
  }
  func.func @transform_0(%arg0: i32) -> (i32, i32) {
    %c0_i32 = arith.constant 0 : i32
    %c0_i32_0 = arith.constant 0 : i32
    return %arg0, %c0_i32 : i32, i32
  }
  func.func @transform_1(%arg0: i32) -> (i32, i32) {
    %c0_i32 = arith.constant 0 : i32
    %c0_i32_0 = arith.constant 0 : i32
    %c0_i32_1 = arith.constant 0 : i32
    return %c0_i32, %c0_i32_0 : i32, i32
  }
  func.func @transform_2(%arg0: i32) -> (i32, i32) {
    %c0_i32 = arith.constant 0 : i32
    %c0_i32_0 = arith.constant 0 : i32
    %c0_i32_1 = arith.constant 0 : i32
    return %c0_i32, %c0_i32_0 : i32, i32
  }
  func.func @transform_3(%arg0: i32) -> (i32, i32) {
    %c0_i32 = arith.constant 0 : i32
    %c0_i32_0 = arith.constant 0 : i32
    return %arg0, %c0_i32 : i32, i32
  }
}

</mosaic_0001>

<bundles_post_ra>
// kernel: gated_conv2d.1
= control target key start
LH: loop header
LB: loop body
LE: loop exit
PB: predicated region body
PF: predicated region fallthrough
CT: control target
= control target key end

     0   :  { %s1254_s12 = smov 0   ;;  %s1639_s0 = inlined_call_operand.vmem [shape: f32[512,36], index: 0, kind: input, shape index: {}]   ;;  %s1640_s1 = inlined_call_operand.vmem [shape: f32[36,256], index: 1, kind: input, shape index: {}]   ;;  %s1641_s2 = inlined_call_operand.vmem [shape: f32[1,256], index: 2, kind: input, shape index: {}]   ;;  %s1642_s3 = inlined_call_operand.vmem [shape: f32[512,128], index: 3, kind: output, shape index: {}]  }
   0x1 LB: > { %s997_s13 = sadd.s32 4294967295, %s1231_s12   ;;  %p1001_p0 = scmp.ge.s32.totalorder %s1231_s12, 1  ;;  %s1231_s12 = sphi %s1254_s12, %s13_s12  }
   0x2   : > { %p138_p1 = scmp.lt.s32.totalorder %s1231_s12, 3 }
   0x4   : > { %p139_p2 = pnand %p1001_p0, %p138_p1 }
   0x5   : > { %v207_v0 = vld [vmem:[%s1640_s1 + $0x8] sm:$0xff] (!%p139_p2)  ;;  %v209_v1 = vld [vmem:[%s1640_s1 + $0x18] sm:$0xff] (!%p139_p2)  ;;  %v206_v2 = vld [vmem:[%s1640_s1] sm:$0xff] (!%p139_p2)  ;;  %s1002_s20 = sshll.u32 (!%p139_p2), %s997_s13, 5  ;;  %v1233_v7 = vmov (!%p139_p2), 0.0   ;;  %vm325_vm0 = vcmask (!%p139_p2), 1043456   ;;  %v218_v47 = vlaneseq (!%p139_p2) }
   0x6   : > { %142 = sbr.rel (%p139_p2) target bundleno = 337 (0x151), region = 32  ;;  %v1074_v3 = vpack.c.bf16 (!%p139_p2), %v209_v1, %v207_v0  ;;  %v208_v4 = vld [vmem:[%s1640_s1 + $0x10] sm:$0xff] (!%p139_p2)  ;;  %v211_v5 = vld [vmem:[%s1640_s1 + $0x28] sm:$0xff] (!%p139_p2)  ;;  %v213_v6 = vld [vmem:[%s1640_s1 + $0x38] sm:$0xff] (!%p139_p2)  ;;  %396 = vmatprep.mubr.f32.mxu0 (!%p139_p2), %v1233_v7  ;;  %492 = vmatprep.mubr.f32.mxu1 (!%p139_p2), %v1233_v7  ;;  %p163_p3 = scmp.lt.s32.totalorder (!%p139_p2), %s1002_s20, 63  ;;  %vm228_vm1 = vcmask (!%p139_p2), 293888  }
   0x7   : > { %v1076_v8 = vpack.c.bf16 (!%p139_p2), %v208_v4, %v206_v2  ;;  %v1078_v9 = vpack.c.bf16 (!%p139_p2), %v213_v6, %v211_v5  ;;  %v210_v10 = vld [vmem:[%s1640_s1 + $0x20] sm:$0xff] (!%p139_p2)  ;;  %v212_v11 = vld [vmem:[%s1640_s1 + $0x30] sm:$0xff] (!%p139_p2)  ;;  %v215_v13 = vld [vmem:[%s1640_s1 + $0x48] sm:$0xf] (!%p139_p2)  ;;  %v219_v48 = vshrl.u32 (!%p139_p2), %v218_v47, 7 }
   0x8   : > { %1075 = vmatprep.subr.bf16.mxu0 (!%p139_p2), %v1074_v3  ;;  %1082 = vmatprep.subr.bf16.mxu1 (!%p139_p2), %v1074_v3  ;;  %v1080_v12 = vpack.c.bf16 (!%p139_p2), %v212_v11, %v210_v10  ;;  %v214_v14 = vld [vmem:[%s1640_s1 + $0x40] sm:$0xf] (!%p139_p2) }
   0x9   : > { %1077 = vmatpush1.bf16.msra.mxu0 (!%p139_p2), %v1076_v8  ;;  %1085 = vmatpush1.bf16.msra.mxu1 (!%p139_p2), %v1076_v8  ;;  %v224_v49 = vsub.s32 (!%p139_p2), 1, %v219_v48  ;;  %v216_v50 = vld [vmem:[%s1641_s2] sm:$0x3] (!%p139_p2)  ;;  %v220_v2 = vsub.s32 (!%p139_p2), 0, %v219_v48 }
   0xa   : > { %1079 = vmatprep.subr.bf16.mxu0 (!%p139_p2), %v1078_v9  ;;  %1083 = vmatprep.subr.bf16.mxu1 (!%p139_p2), %v1078_v9 }
   0xb   : > { %v1401_v51 = vrot.slane (!%p139_p2), %v216_v50, %v224_v49  ;;  %v1413_v11 = vrot.slane (!%p139_p2), %v216_v50, %v220_v2 }
   0xd   : > { %s1644_s20 = smov (!%p163_p3, %s1002_s20), 63  ;;  %1081 = vmatpush1.bf16.msra.mxu0 %v1080_v12  ;;  %1086 = vmatpush1.bf16.msra.mxu1 %v1080_v12 }
   0xe   : > { %s1003_s4 = sshll.u32 %s1644_s20, 3  ;;  %1006 = vmatprep.subr.msk.mxu0 %vm325_vm0, %v215_v13  ;;  %1084 = vmatprep.subr.msk.mxu1 %vm325_vm0, %v215_v13 }
   0xf   : > { %s1299_s9 = scalar_lea.vmem %s1639_s0, %s1003_s4  ;;  %s1457_s17 = scalar_lea.vmem %s1642_s3, %s1003_s4 }
  0x10   : > { %v174_v15 = vld [vmem:[%s1299_s9] sm:$0xff]  ;;  %v175_v17 = vld [vmem:[%s1299_s9 + $0x8] sm:$0xff]  ;;  %v176_v19 = vld [vmem:[%s1299_s9 + $0x10] sm:$0xff] }
  0x11   : > { %v190_v16 = vld [vmem:[%s1299_s9 + $0x80] sm:$0xff]  ;;  %1007 = vmatpush1.msk.msra.mxu0 %vm325_vm0, %v214_v14  ;;  %1087 = vmatpush1.msk.msra.mxu1 %vm325_vm0, %v214_v14  ;;  %v191_v18 = vld [vmem:[%s1299_s9 + $0x88] sm:$0xff]  ;;  %v192_v20 = vld [vmem:[%s1299_s9 + $0x90] sm:$0xff] }
  0x12   : > { %1008 = vmatmul.mubr.msk.f32.vlgmr.msra.gmra.mrb[0].mxu0 %vm228_vm1, %v174_v15  ;;  %1024 = vmatmul.mubr.msk.f32.vlgmr.msra.gmra.mrb[0].mxu1 %vm228_vm1, %v190_v16  ;;  %v177_v21 = vld [vmem:[%s1299_s9 + $0x18] sm:$0xff]  ;;  %v178_v23 = vld [vmem:[%s1299_s9 + $0x20] sm:$0xff]  ;;  %v179_v25 = vld [vmem:[%s1299_s9 + $0x28] sm:$0xff] }
  0x13   : > { %402 = vmatprep.mubr.f32.mxu0 %v1233_v7  ;;  %498 = vmatprep.mubr.f32.mxu1 %v1233_v7  ;;  %v193_v22 = vld [vmem:[%s1299_s9 + $0x98] sm:$0xff]  ;;  %v194_v24 = vld [vmem:[%s1299_s9 + $0xa0] sm:$0xff]  ;;  %v195_v26 = vld [vmem:[%s1299_s9 + $0xa8] sm:$0xff] }
  0x14   : > { %v180_v27 = vld [vmem:[%s1299_s9 + $0x30] sm:$0xff]  ;;  %v181_v29 = vld [vmem:[%s1299_s9 + $0x38] sm:$0xff]  ;;  %v182_v31 = vld [vmem:[%s1299_s9 + $0x40] sm:$0xff] }
  0x15   : > { %v196_v28 = vld [vmem:[%s1299_s9 + $0xb0] sm:$0xff]  ;;  %v197_v30 = vld [vmem:[%s1299_s9 + $0xb8] sm:$0xff]  ;;  %v198_v32 = vld [vmem:[%s1299_s9 + $0xc0] sm:$0xff] }
  0x16   : > { %1009 = vmatmul.mubr.msk.f32.gmra.mrb[2].mxu0 %vm228_vm1, %v175_v17  ;;  %1025 = vmatmul.mubr.msk.f32.gmra.mrb[2].mxu1 %vm228_vm1, %v191_v18  ;;  %v183_v33 = vld [vmem:[%s1299_s9 + $0x48] sm:$0xff]  ;;  %v184_v35 = vld [vmem:[%s1299_s9 + $0x50] sm:$0xff]  ;;  %v185_v37 = vld [vmem:[%s1299_s9 + $0x58] sm:$0xff] }
  0x17   : > { %408 = vmatprep.mubr.f32.mxu0 %v1233_v7  ;;  %504 = vmatprep.mubr.f32.mxu1 %v1233_v7  ;;  %v199_v34 = vld [vmem:[%s1299_s9 + $0xc8] sm:$0xff]  ;;  %v200_v36 = vld [vmem:[%s1299_s9 + $0xd0] sm:$0xff]  ;;  %v201_v38 = vld [vmem:[%s1299_s9 + $0xd8] sm:$0xff] }
  0x18   : > { %v186_v39 = vld [vmem:[%s1299_s9 + $0x60] sm:$0xff]  ;;  %v187_v41 = vld [vmem:[%s1299_s9 + $0x68] sm:$0xff]  ;;  %v188_v43 = vld [vmem:[%s1299_s9 + $0x70] sm:$0xff] }
  0x19   : > { %v202_v40 = vld [vmem:[%s1299_s9 + $0xe0] sm:$0xff]  ;;  %v203_v42 = vld [vmem:[%s1299_s9 + $0xe8] sm:$0xff]  ;;  %v204_v44 = vld [vmem:[%s1299_s9 + $0xf0] sm:$0xff] }
  0x1a   : > { %1010 = vmatmul.mubr.msk.f32.gmra.mrb[4].mxu0 %vm228_vm1, %v176_v19  ;;  %1026 = vmatmul.mubr.msk.f32.gmra.mrb[4].mxu1 %vm228_vm1, %v192_v20  ;;  %v189_v45 = vld [vmem:[%s1299_s9 + $0x78] sm:$0xff] }
  0x1b   : > { %414 = vmatprep.mubr.f32.mxu0 %v1233_v7  ;;  %510 = vmatprep.mubr.f32.mxu1 %v1233_v7  ;;  %v205_v46 = vld [vmem:[%s1299_s9 + $0xf8] sm:$0xff] }
  0x1e   : > { %1011 = vmatmul.mubr.msk.f32.gmra.mrb[6].mxu0 %vm228_vm1, %v177_v21  ;;  %1027 = vmatmul.mubr.msk.f32.gmra.mrb[6].mxu1 %vm228_vm1, %v193_v22 }
  0x1f   : > { %420 = vmatprep.mubr.f32.mxu0 %v1233_v7  ;;  %516 = vmatprep.mubr.f32.mxu1 %v1233_v7 }
  0x22   : > { %1012 = vmatmul.mubr.msk.f32.gmra.mrb[8].mxu0 %vm228_vm1, %v178_v23  ;;  %1028 = vmatmul.mubr.msk.f32.gmra.mrb[8].mxu1 %vm228_vm1, %v194_v24 }
  0x23   : > { %426 = vmatprep.mubr.f32.mxu0 %v1233_v7  ;;  %522 = vmatprep.mubr.f32.mxu1 %v1233_v7 }
  0x26   : > { %1013 = vmatmul.mubr.msk.f32.gmra.mrb[10].mxu0 %vm228_vm1, %v179_v25  ;;  %1029 = vmatmul.mubr.msk.f32.gmra.mrb[10].mxu1 %vm228_vm1, %v195_v26 }
  0x27   : > { %432 = vmatprep.mubr.f32.mxu0 %v1233_v7  ;;  %528 = vmatprep.mubr.f32.mxu1 %v1233_v7 }
  0x2a   : > { %1014 = vmatmul.mubr.msk.f32.gmra.mrb[12].mxu0 %vm228_vm1, %v180_v27  ;;  %1030 = vmatmul.mubr.msk.f32.gmra.mrb[12].mxu1 %vm228_vm1, %v196_v28 }
  0x2b   : > { %438 = vmatprep.mubr.f32.mxu0 %v1233_v7  ;;  %534 = vmatprep.mubr.f32.mxu1 %v1233_v7 }
  0x2e   : > { %1015 = vmatmul.mubr.msk.f32.gmra.mrb[14].mxu0 %vm228_vm1, %v181_v29  ;;  %1031 = vmatmul.mubr.msk.f32.gmra.mrb[14].mxu1 %vm228_vm1, %v197_v30 }
  0x2f   : > { %444 = vmatprep.mubr.f32.mxu0 %v1233_v7  ;;  %540 = vmatprep.mubr.f32.mxu1 %v1233_v7 }
  0x32   : > { %1016 = vmatmul.mubr.msk.f32.gmra.mrb[16].mxu0 %vm228_vm1, %v182_v31  ;;  %1032 = vmatmul.mubr.msk.f32.gmra.mrb[16].mxu1 %vm228_vm1, %v198_v32 }
  0x33   : > { %450 = vmatprep.mubr.f32.mxu0 %v1233_v7  ;;  %546 = vmatprep.mubr.f32.mxu1 %v1233_v7 }
  0x36   : > { %1017 = vmatmul.mubr.msk.f32.gmra.mrb[18].mxu0 %vm228_vm1, %v183_v33  ;;  %1033 = vmatmul.mubr.msk.f32.gmra.mrb[18].mxu1 %vm228_vm1, %v199_v34 }
  0x37   : > { %456 = vmatprep.mubr.f32.mxu0 %v1233_v7  ;;  %552 = vmatprep.mubr.f32.mxu1 %v1233_v7 }
  0x3a   : > { %1018 = vmatmul.mubr.msk.f32.gmra.mrb[20].mxu0 %vm228_vm1, %v184_v35  ;;  %1034 = vmatmul.mubr.msk.f32.gmra.mrb[20].mxu1 %vm228_vm1, %v200_v36 }
  0x3b   : > { %462 = vmatprep.mubr.f32.mxu0 %v1233_v7  ;;  %558 = vmatprep.mubr.f32.mxu1 %v1233_v7 }
  0x3e   : > { %1019 = vmatmul.mubr.msk.f32.gmra.mrb[22].mxu0 %vm228_vm1, %v185_v37  ;;  %1035 = vmatmul.mubr.msk.f32.gmra.mrb[22].mxu1 %vm228_vm1, %v201_v38 }
  0x3f   : > { %468 = vmatprep.mubr.f32.mxu0 %v1233_v7  ;;  %564 = vmatprep.mubr.f32.mxu1 %v1233_v7 }
  0x42   : > { %1020 = vmatmul.mubr.msk.f32.gmra.mrb[24].mxu0 %vm228_vm1, %v186_v39  ;;  %1036 = vmatmul.mubr.msk.f32.gmra.mrb[24].mxu1 %vm228_vm1, %v202_v40 }
  0x43   : > { %474 = vmatprep.mubr.f32.mxu0 %v1233_v7  ;;  %570 = vmatprep.mubr.f32.mxu1 %v1233_v7 }
  0x46   : > { %1021 = vmatmul.mubr.msk.f32.gmra.mrb[26].mxu0 %vm228_vm1, %v187_v41  ;;  %1037 = vmatmul.mubr.msk.f32.gmra.mrb[26].mxu1 %vm228_vm1, %v203_v42 }
  0x47   : > { %480 = vmatprep.mubr.f32.mxu0 %v1233_v7  ;;  %576 = vmatprep.mubr.f32.mxu1 %v1233_v7 }
  0x4a   : > { %1022 = vmatmul.mubr.msk.f32.gmra.mrb[28].mxu0 %vm228_vm1, %v188_v43  ;;  %1038 = vmatmul.mubr.msk.f32.gmra.mrb[28].mxu1 %vm228_vm1, %v204_v44 }
  0x4b   : > { %486 = vmatprep.mubr.f32.mxu0 %v1233_v7  ;;  %582 = vmatprep.mubr.f32.mxu1 %v1233_v7 }
  0x4e   : > { %1023 = vmatmul.mubr.msk.f32.gmra.mrb[30].mxu0 %vm228_vm1, %v189_v45  ;;  %1039 = vmatmul.mubr.msk.f32.gmra.mrb[30].mxu1 %vm228_vm1, %v205_v46 }
  0xe5   : > { %v398_v52 = vpop.f32.mrb[0].mxu0  ;;  %v494_v53 = vpop.f32.mrb[0].mxu1 }
  0xe6   : > { %v400_v54 = vpop.f32.mrb[1].mxu0  ;;  %v496_v55 = vpop.f32.mrb[1].mxu1  ;;  %v399_v21 = vadd.f32 %v398_v52, %v1413_v11  ;;  %v495_v28 = vadd.f32 %v494_v53, %v1413_v11 }
  0xe7   : > { %v401_v56 = vadd.f32 %v400_v54, %v1401_v51  ;;  %v497_v57 = vadd.f32 %v496_v55, %v1401_v51 }
  0xe8   : > { %vm589_vm2 = vcmp.ge.f32.partialorder %v399_v21, 0.0  ;;  %v621_v37 = vmul.f32 0.01, %v399_v21  ;;  %vm605_vm3 = vcmp.ge.f32.partialorder %v495_v28, 0.0  ;;  %v637_v44 = vmul.f32 0.01, %v495_v28 }
  0xe9   : > { %v1040_v58 = vmul.f32 -1.442695, %v401_v56  ;;  %v1056_v59 = vmul.f32 -1.442695, %v497_v57  ;;  %v404_v60 = vpop.f32.mrb[2].mxu0  ;;  %v1405_v61 = vpop.f32.mrb[2].mxu1 }
  0xea   : > { %v406_v62 = vpop.f32.mrb[3].mxu0  ;;  %v502_v63 = vpop.f32.mrb[3].mxu1  ;;  %v405_v45 = vadd.f32 %v404_v60, %v1413_v11  ;;  %v501_v47 = vadd.f32 %v1405_v61, %v1413_v11  ;;  %v653_v54 = vsel %vm589_vm2, %v399_v21, %v621_v37 }
  0xeb   : > { %1097 = vpow2.f32 %v1040_v58  ;;  %v407_v0 = vadd.f32 %v406_v62, %v1401_v51  ;;  %v503_v1 = vadd.f32 %v502_v63, %v1401_v51  ;;  %v669_v62 = vsel %vm605_vm3, %v495_v28, %v637_v44 }
  0xec   : > { %1099 = vpow2.f32 %v1056_v59  ;;  %vm590_vm4 = vcmp.ge.f32.partialorder %v405_v45, 0.0  ;;  %vm606_vm5 = vcmp.ge.f32.partialorder %v501_v47, 0.0 }
  0xed   : > { %v1041_v3 = vmul.f32 -1.442695, %v407_v0  ;;  %v1057_v4 = vmul.f32 -1.442695, %v503_v1  ;;  %v410_v5 = vpop.f32.mrb[4].mxu0  ;;  %v1409_v6 = vpop.f32.mrb[4].mxu1 }
  0xee   : > { %v412_v7 = vpop.f32.mrb[5].mxu0  ;;  %v508_v8 = vpop.f32.mrb[5].mxu1  ;;  %v411_v55 = vadd.f32 %v410_v5, %v1413_v11  ;;  %v507_v59 = vadd.f32 %v1409_v6, %v1413_v11  ;;  %v622_v1 = vmul.f32 0.01, %v405_v45  ;;  %v638_v6 = vmul.f32 0.01, %v501_v47 }
  0xef   : > { %1101 = vpow2.f32 %v1041_v3  ;;  %v413_v9 = vadd.f32 %v412_v7, %v1401_v51  ;;  %v509_v10 = vadd.f32 %v508_v8, %v1401_v51 }
  0xf0   : > { %1103 = vpow2.f32 %v1057_v4  ;;  %vm591_vm6 = vcmp.ge.f32.partialorder %v411_v55, 0.0  ;;  %vm607_vm7 = vcmp.ge.f32.partialorder %v507_v59, 0.0 }
  0xf1   : > { %v1042_v12 = vmul.f32 -1.442695, %v413_v9  ;;  %v1058_v13 = vmul.f32 -1.442695, %v509_v10  ;;  %v1415_v14 = vpop.f32.mrb[6].mxu0  ;;  %v1417_v15 = vpop.f32.mrb[6].mxu1 }
  0xf2   : > { %v418_v16 = vpop.f32.mrb[7].mxu0  ;;  %v514_v17 = vpop.f32.mrb[7].mxu1 }
  0xf3   : > { %1105 = vpow2.f32 %v1042_v12  ;;  %v419_v18 = vadd.f32 %v418_v16, %v1401_v51  ;;  %v515_v19 = vadd.f32 %v514_v17, %v1401_v51  ;;  %v639_v16 = vmul.f32 0.01, %v507_v59 }
  0xf4   : > { %1107 = vpow2.f32 %v1058_v13  ;;  %v623_v13 = vmul.f32 0.01, %v411_v55 }
  0xf5   : > { %v1098_v20 = vpop.eup %1097  ;;  %v1422_v22 = vpop.f32.mrb[8].mxu0  ;;  %v1043_v26 = vmul.f32 -1.442695, %v419_v18  ;;  %v1059_v30 = vmul.f32 -1.442695, %v515_v19  ;;  %v1462_v19 = vadd.f32 %v1415_v14, %v1413_v11 }
  0xf6   : > { %v1424_v23 = vpop.f32.mrb[8].mxu1  ;;  %v1100_v24 = vpop.eup %1099  ;;  %v781_v25 = vadd.f32 1.0, %v1098_v20  ;;  %v423_v44 = vadd.f32 %v1422_v22, %v1413_v11 }
  0xf7   : > { %v424_v27 = vpop.f32.mrb[9].mxu0  ;;  %v797_v29 = vadd.f32 1.0, %v1100_v24  ;;  %v520_v31 = vpop.f32.mrb[9].mxu1  ;;  %v654_v24 = vsel %vm590_vm4, %v405_v45, %v622_v1  ;;  %vm592_vm8 = vcmp.ge.f32.partialorder %v1462_v19, 0.0 }
  0xf8   : > { %1109 = vrcp.f32 %v781_v25  ;;  %v425_v33 = vadd.f32 %v424_v27, %v1401_v51  ;;  %v521_v39 = vadd.f32 %v520_v31, %v1401_v51  ;;  %vm593_vm10 = vcmp.ge.f32.partialorder %v423_v44, 0.0 }
  0xf9   : > { %v1102_v32 = vpop.eup %1101  ;;  %1111 = vrcp.f32 %v797_v29  ;;  %v1428_v34 = vpop.f32.mrb[10].mxu0 }
  0xfa   : > { %v1430_v35 = vpop.f32.mrb[10].mxu1  ;;  %v1104_v36 = vpop.eup %1103  ;;  %v782_v38 = vadd.f32 1.0, %v1102_v32  ;;  %1113 = vpow2.f32 %v1043_v26  ;;  %v1044_v43 = vmul.f32 -1.442695, %v425_v33  ;;  %v1060_v46 = vmul.f32 -1.442695, %v521_v39 }
  0xfb   : > { %v430_v40 = vpop.f32.mrb[11].mxu0  ;;  %v526_v41 = vpop.f32.mrb[11].mxu1  ;;  %v798_v42 = vadd.f32 1.0, %v1104_v36  ;;  %1115 = vpow2.f32 %v1059_v30  ;;  %v670_v30 = vsel %vm606_vm5, %v501_v47, %v638_v6  ;;  %v513_v39 = vadd.f32 %v1417_v15, %v1413_v11 }
  0xfc   : > { %1117 = vrcp.f32 %v782_v38  ;;  %v431_v48 = vadd.f32 %v430_v40, %v1401_v51  ;;  %v527_v49 = vadd.f32 %v526_v41, %v1401_v51  ;;  %v655_v38 = vsel %vm591_vm6, %v411_v55, %v623_v13 }
  0xfd   : > { %1119 = vrcp.f32 %v798_v42  ;;  %v1438_v50 = vpop.f32.mrb[12].mxu0  ;;  %v1440_v52 = vpop.f32.mrb[12].mxu1  ;;  %v671_v42 = vsel %vm607_vm7, %v507_v59, %v639_v16  ;;  %v624_v15 = vmul.f32 0.01, %v1462_v19  ;;  %vm608_vm9 = vcmp.ge.f32.partialorder %v513_v39, 0.0 }
  0xfe   : > { %v1106_v53 = vpop.eup %1105  ;;  %1121 = vpow2.f32 %v1044_v43  ;;  %v436_v56 = vpop.f32.mrb[13].mxu0  ;;  %v1045_v61 = vmul.f32 -1.442695, %v431_v48  ;;  %v1061_v0 = vmul.f32 -1.442695, %v527_v49  ;;  %v519_v49 = vadd.f32 %v1424_v23, %v1413_v11 }
  0xff   : > { %v532_v57 = vpop.f32.mrb[13].mxu1  ;;  %v1108_v58 = vpop.eup %1107  ;;  %v783_v60 = vadd.f32 1.0, %v1106_v53  ;;  %1123 = vpow2.f32 %v1060_v46  ;;  %v437_v2 = vadd.f32 %v436_v56, %v1401_v51  ;;  %v640_v22 = vmul.f32 0.01, %v513_v39 }
 0x100   : > { %v799_v63 = vadd.f32 1.0, %v1108_v58  ;;  %v533_v7 = vadd.f32 %v532_v57, %v1401_v51  ;;  %v641_v6 = vmul.f32 0.01, %v519_v49  ;;  %vm609_vm11 = vcmp.ge.f32.partialorder %v519_v49, 0.0 }
 0x101   : > { %1125 = vrcp.f32 %v783_v60  ;;  %v1448_v3 = vpop.f32.mrb[14].mxu0  ;;  %v1450_v4 = vpop.f32.mrb[14].mxu1  ;;  %v1046_v20 = vmul.f32 -1.442695, %v437_v2 }
 0x102   : > { %v1110_v5 = vpop.eup %1109  ;;  %1127 = vrcp.f32 %v799_v63  ;;  %v442_v8 = vpop.f32.mrb[15].mxu0  ;;  %v1062_v26 = vmul.f32 -1.442695, %v533_v7 }
 0x103   : > { %v538_v9 = vpop.f32.mrb[15].mxu1  ;;  %v1112_v10 = vpop.eup %1111  ;;  %v877_v12 = vmul.f32 %v1110_v5, %v653_v54  ;;  %1129 = vpow2.f32 %v1045_v61  ;;  %v443_v14 = vadd.f32 %v442_v8, %v1401_v51 }
 0x104   : > { %v1114_v17 = vpop.eup %1113  ;;  %v893_v18 = vmul.f32 %v1112_v10, %v669_v62  ;;  %1131 = vpow2.f32 %v1061_v0  ;;  %v539_v54 = vadd.f32 %v538_v9, %v1401_v51  ;;  %v625_v0 = vmul.f32 0.01, %v423_v44 }
 0x105   : > { %v1116_v21 = vpop.eup %1115  ;;  %909 = vst [vmem:[%s1457_s17] sm:$0xff] %v877_v12  ;;  %v784_v25 = vadd.f32 1.0, %v1114_v17  ;;  %v1466_v27 = vpop.f32.mrb[16].mxu0  ;;  %1133 = vpow2.f32 %v1046_v20  ;;  %v1047_v46 = vmul.f32 -1.442695, %v443_v14  ;;  %v429_v10 = vadd.f32 %v1428_v34, %v1413_v11 }
 0x106   : > { %v1468_v28 = vpop.f32.mrb[16].mxu1  ;;  %v1118_v29 = vpop.eup %1117  ;;  %925 = vst [vmem:[%s1457_s17 + $0x80] sm:$0xff] %v893_v18  ;;  %v800_v31 = vadd.f32 1.0, %v1116_v21  ;;  %v1063_v61 = vmul.f32 -1.442695, %v539_v54  ;;  %v656_v17 = vsel %vm592_vm8, %v1462_v19, %v624_v15  ;;  %v673_v19 = vsel %vm609_vm11, %v519_v49, %v641_v6 }
 0x107   : > { %v448_v32 = vpop.f32.mrb[17].mxu0  ;;  %v544_v33 = vpop.f32.mrb[17].mxu1  ;;  %v878_v37 = vmul.f32 %v1118_v29, %v654_v24  ;;  %1135 = vrcp.f32 %v784_v25  ;;  %v672_v24 = vsel %vm608_vm9, %v513_v39, %v640_v22  ;;  %v657_v25 = vsel %vm593_vm10, %v423_v44, %v625_v0 }
 0x108   : > { %v1120_v36 = vpop.eup %1119  ;;  %1137 = vrcp.f32 %v800_v31  ;;  %v449_v58 = vadd.f32 %v448_v32, %v1401_v51  ;;  %v545_v62 = vadd.f32 %v544_v33, %v1401_v51  ;;  %v525_v14 = vadd.f32 %v1430_v35, %v1413_v11 }
 0x109   : > { %v1122_v40 = vpop.eup %1121  ;;  %v894_v41 = vmul.f32 %v1120_v36, %v670_v30  ;;  %910 = vst [vmem:[%s1457_s17 + $0x8] sm:$0xff] %v878_v37  ;;  %1139 = vpow2.f32 %v1062_v26  ;;  %v1481_v47 = vpop.f32.mrb[18].mxu0  ;;  %vm594_vm12 = vcmp.ge.f32.partialorder %v429_v10, 0.0  ;;  %v435_v39 = vadd.f32 %v1438_v50, %v1413_v11 }
 0x10a   : > { %v1124_v43 = vpop.eup %1123  ;;  %v785_v45 = vadd.f32 1.0, %v1122_v40  ;;  %v1483_v48 = vpop.f32.mrb[18].mxu1  ;;  %v1048_v8 = vmul.f32 -1.442695, %v449_v58  ;;  %v1064_v18 = vmul.f32 -1.442695, %v545_v62 }
 0x10b   : > { %926 = vst [vmem:[%s1457_s17 + $0x88] sm:$0xff] %v894_v41  ;;  %v801_v53 = vadd.f32 1.0, %v1124_v43  ;;  %v454_v55 = vpop.f32.mrb[19].mxu0  ;;  %v550_v56 = vpop.f32.mrb[19].mxu1  ;;  %v626_v35 = vmul.f32 0.01, %v429_v10  ;;  %v531_v43 = vadd.f32 %v1440_v52, %v1413_v11 }
 0x10c   : > { %v1126_v57 = vpop.eup %1125  ;;  %1141 = vrcp.f32 %v785_v45  ;;  %v455_v20 = vadd.f32 %v454_v55, %v1401_v51  ;;  %v551_v41 = vadd.f32 %v550_v56, %v1401_v51  ;;  %vm610_vm13 = vcmp.ge.f32.partialorder %v525_v14, 0.0 }
 0x10d   : > { %v1128_v59 = vpop.eup %1127  ;;  %v879_v60 = vmul.f32 %v1126_v57, %v655_v38  ;;  %1143 = vrcp.f32 %v801_v53  ;;  %v1492_v1 = vpop.f32.mrb[20].mxu0  ;;  %v642_v57 = vmul.f32 0.01, %v525_v14  ;;  %v627_v58 = vmul.f32 0.01, %v435_v39 }
 0x10e   : > { %v1130_v23 = vpop.eup %1129  ;;  %v895_v63 = vmul.f32 %v1128_v59, %v671_v42  ;;  %1145 = vpow2.f32 %v1047_v46  ;;  %v1494_v2 = vpop.f32.mrb[20].mxu1  ;;  %v1049_v38 = vmul.f32 -1.442695, %v455_v20  ;;  %v1065_v49 = vmul.f32 -1.442695, %v551_v41 }
 0x10f   : > { %v1132_v5 = vpop.eup %1131  ;;  %911 = vst [vmem:[%s1457_s17 + $0x10] sm:$0xff] %v879_v60  ;;  %v786_v7 = vadd.f32 1.0, %v1130_v23  ;;  %1147 = vpow2.f32 %v1063_v61  ;;  %v460_v9 = vpop.f32.mrb[21].mxu0  ;;  %v658_v61 = vsel %vm594_vm12, %v429_v10, %v626_v35  ;;  %vm595_vm14 = vcmp.ge.f32.partialorder %v435_v39, 0.0 }
 0x110   : > { %927 = vst [vmem:[%s1457_s17 + $0x90] sm:$0xff] %v895_v63  ;;  %v802_v12 = vadd.f32 1.0, %v1132_v5  ;;  %v556_v13 = vpop.f32.mrb[21].mxu1  ;;  %v1134_v16 = vpop.eup %1133  ;;  %v461_v44 = vadd.f32 %v460_v9, %v1401_v51  ;;  %v643_v6 = vmul.f32 0.01, %v531_v43  ;;  %vm611_vm15 = vcmp.ge.f32.partialorder %v531_v43, 0.0 }
 0x111   : > { %1149 = vrcp.f32 %v786_v7  ;;  %v1136_v21 = vpop.eup %1135  ;;  %v787_v26 = vadd.f32 1.0, %v1134_v16  ;;  %v1506_v34 = vpop.f32.mrb[22].mxu0  ;;  %v557_v53 = vadd.f32 %v556_v13, %v1401_v51  ;;  %v441_v7 = vadd.f32 %v1448_v3, %v1413_v11 }
 0x112   : > { %1151 = vrcp.f32 %v802_v12  ;;  %v1508_v29 = vpop.f32.mrb[22].mxu1  ;;  %v1138_v30 = vpop.eup %1137  ;;  %v880_v31 = vmul.f32 %v1136_v21, %v656_v17  ;;  %v1050_v60 = vmul.f32 -1.442695, %v461_v44  ;;  %v674_v13 = vsel %vm610_vm13, %v525_v14, %v642_v57 }
 0x113   : > { %1153 = vpow2.f32 %v1048_v8  ;;  %v466_v32 = vpop.f32.mrb[23].mxu0  ;;  %v1513_v33 = vpop.f32.mrb[23].mxu1  ;;  %v896_v37 = vmul.f32 %v1138_v30, %v672_v24  ;;  %v1066_v23 = vmul.f32 -1.442695, %v557_v53  ;;  %v659_v20 = vsel %vm595_vm14, %v435_v39, %v627_v58 }
 0x114   : > { %v1140_v36 = vpop.eup %1139  ;;  %1155 = vrcp.f32 %v787_v26  ;;  %912 = vst [vmem:[%s1457_s17 + $0x18] sm:$0xff] %v880_v31  ;;  %v467_v8 = vadd.f32 %v466_v32, %v1401_v51  ;;  %v537_v21 = vadd.f32 %v1450_v4, %v1413_v11  ;;  %vm596_vm0 = vcmp.ge.f32.partialorder %v441_v7, 0.0 }
 0x115   : > { %v803_v40 = vadd.f32 1.0, %v1140_v36  ;;  %1157 = vpow2.f32 %v1064_v18  ;;  %928 = vst [vmem:[%s1457_s17 + $0x98] sm:$0xff] %v896_v37  ;;  %v1523_v45 = vpop.f32.mrb[24].mxu0  ;;  %v1525_v46 = vpop.f32.mrb[24].mxu1  ;;  %v563_v32 = vadd.f32 %v1513_v33, %v1401_v51  ;;  %v543_v53 = vadd.f32 %v1468_v28, %v1413_v11 }
 0x116   : > { %v1142_v42 = vpop.eup %1141  ;;  %1159 = vpow2.f32 %v1049_v38  ;;  %v472_v54 = vpop.f32.mrb[25].mxu0  ;;  %v628_v38 = vmul.f32 0.01, %v441_v7  ;;  %vm612_vm1 = vcmp.ge.f32.partialorder %v537_v21, 0.0  ;;  %v644_v33 = vmul.f32 0.01, %v537_v21 }
 0x117   : > { %v1144_v15 = vpop.eup %1143  ;;  %v881_v50 = vmul.f32 %v1142_v42, %v657_v25  ;;  %1161 = vrcp.f32 %v803_v40  ;;  %v1528_v55 = vpop.f32.mrb[25].mxu1  ;;  %v1051_v25 = vmul.f32 -1.442695, %v467_v8  ;;  %v473_v40 = vadd.f32 %v472_v54, %v1401_v51 }
 0x118   : > { %v1146_v56 = vpop.eup %1145  ;;  %v897_v52 = vmul.f32 %v1144_v15, %v673_v19  ;;  %1163 = vpow2.f32 %v1065_v49  ;;  %v675_v19 = vsel %vm611_vm15, %v531_v43, %v643_v6  ;;  %v447_v42 = vadd.f32 %v1466_v27, %v1413_v11 }
 0x119   : > { %v1148_v22 = vpop.eup %1147  ;;  %913 = vst [vmem:[%s1457_s17 + $0x20] sm:$0xff] %v881_v50  ;;  %v788_v59 = vadd.f32 1.0, %v1146_v56  ;;  %v1533_v63 = vpop.f32.mrb[26].mxu0  ;;  %v1067_v43 = vmul.f32 -1.442695, %v563_v32  ;;  %v569_v27 = vadd.f32 %v1528_v55, %v1401_v51  ;;  %v660_v57 = vsel %vm596_vm0, %v441_v7, %v628_v38 }
 0x11a   : > { %929 = vst [vmem:[%s1457_s17 + $0xa0] sm:$0xff] %v897_v52  ;;  %v804_v62 = vadd.f32 1.0, %v1148_v22  ;;  %v1535_v0 = vpop.f32.mrb[26].mxu1  ;;  %v1540_v9 = vpop.f32.mrb[27].mxu0  ;;  %v1052_v54 = vmul.f32 -1.442695, %v473_v40  ;;  %v453_v22 = vadd.f32 %v1481_v47, %v1413_v11 }
 0x11b   : > { %v1150_v5 = vpop.eup %1149  ;;  %1165 = vrcp.f32 %v788_v59  ;;  %v1542_v12 = vpop.f32.mrb[27].mxu1  ;;  %v629_v28 = vmul.f32 0.01, %v447_v42  ;;  %v1068_v55 = vmul.f32 -1.442695, %v569_v27  ;;  %vm597_vm2 = vcmp.ge.f32.partialorder %v447_v42, 0.0 }
 0x11c   : > { %v1152_v10 = vpop.eup %1151  ;;  %v882_v16 = vmul.f32 %v1150_v5, %v658_v61  ;;  %1167 = vrcp.f32 %v804_v62  ;;  %v676_v62 = vsel %vm612_vm1, %v537_v21, %v644_v33  ;;  %vm613_vm3 = vcmp.ge.f32.partialorder %v543_v53, 0.0 }
 0x11d   : > { %v1154_v17 = vpop.eup %1153  ;;  %v898_v18 = vmul.f32 %v1152_v10, %v674_v13  ;;  %1169 = vpow2.f32 %v1050_v60  ;;  %v1549_v26 = vpop.f32.mrb[28].mxu0  ;;  %v549_v60 = vadd.f32 %v1483_v48, %v1413_v11  ;;  %v645_v47 = vmul.f32 0.01, %v543_v53 }
 0x11e   : > { %v1156_v3 = vpop.eup %1155  ;;  %914 = vst [vmem:[%s1457_s17 + $0x28] sm:$0xff] %v882_v16  ;;  %v789_v24 = vadd.f32 1.0, %v1154_v17  ;;  %1171 = vpow2.f32 %v1066_v23  ;;  %v1551_v30 = vpop.f32.mrb[28].mxu1  ;;  %v630_v8 = vmul.f32 0.01, %v453_v22  ;;  %v479_v48 = vadd.f32 %v1540_v9, %v1401_v51 }
 0x11f   : > { %v1158_v31 = vpop.eup %1157  ;;  %930 = vst [vmem:[%s1457_s17 + $0xa8] sm:$0xff] %v898_v18  ;;  %v883_v14 = vmul.f32 %v1156_v3, %v659_v20  ;;  %v484_v36 = vpop.f32.mrb[29].mxu0  ;;  %v575_v13 = vadd.f32 %v1542_v12, %v1401_v51  ;;  %v661_v16 = vsel %vm597_vm2, %v447_v42, %v629_v28  ;;  %vm598_vm4 = vcmp.ge.f32.partialorder %v453_v22, 0.0 }
 0x120   : > { %v1557_v37 = vpop.f32.mrb[29].mxu1  ;;  %v1160_v4 = vpop.eup %1159  ;;  %1173 = vrcp.f32 %v789_v24  ;;  %v805_v39 = vadd.f32 1.0, %v1158_v31  ;;  %v646_v17 = vmul.f32 0.01, %v549_v60  ;;  %v1053_v3 = vmul.f32 -1.442695, %v479_v48 }
 0x121   : > { %v1162_v41 = vpop.eup %1161  ;;  %915 = vst [vmem:[%s1457_s17 + $0x30] sm:$0xff] %v883_v14  ;;  %v790_v35 = vadd.f32 1.0, %v1160_v4  ;;  %1175 = vpow2.f32 %v1051_v25  ;;  %v1563_v15 = vpop.f32.mrb[30].mxu0  ;;  %v1069_v21 = vmul.f32 -1.442695, %v575_v13  ;;  %v485_v24 = vadd.f32 %v484_v36, %v1401_v51 }
 0x122   : > { %v899_v44 = vmul.f32 %v1162_v41, %v675_v19  ;;  %1177 = vrcp.f32 %v805_v39  ;;  %v1565_v50 = vpop.f32.mrb[30].mxu1  ;;  %v1164_v49 = vpop.eup %1163  ;;  %vm614_vm5 = vcmp.ge.f32.partialorder %v549_v60, 0.0  ;;  %v459_v9 = vadd.f32 %v1492_v1, %v1413_v11 }
 0x123   : > { %1179 = vrcp.f32 %v790_v35  ;;  %v1571_v56 = vpop.f32.mrb[31].mxu0  ;;  %v1573_v52 = vpop.f32.mrb[31].mxu1  ;;  %v806_v58 = vadd.f32 1.0, %v1164_v49  ;;  %v677_v19 = vsel %vm613_vm3, %v543_v53, %v645_v47  ;;  %v662_v14 = vsel %vm598_vm4, %v453_v22, %v630_v8 }
 0x124   : > { %931 = vst [vmem:[%s1457_s17 + $0xb0] sm:$0xff] %v899_v44  ;;  %1181 = vpow2.f32 %v1067_v43  ;;  %v555_v36 = vadd.f32 %v1494_v2, %v1413_v11  ;;  %v1054_v39 = vmul.f32 -1.442695, %v485_v24  ;;  %v678_v41 = vsel %vm614_vm5, %v549_v60, %v646_v17 }
 0x125   : > { %v1166_v59 = vpop.eup %1165  ;;  %1183 = vpow2.f32 %v1052_v54  ;;  %v581_v42 = vadd.f32 %v1557_v37, %v1401_v51  ;;  %v631_v43 = vmul.f32 0.01, %v459_v9  ;;  %v465_v44 = vadd.f32 %v1506_v34, %v1413_v11 }
 0x126   : > { %v1168_v61 = vpop.eup %1167  ;;  %v884_v23 = vmul.f32 %v1166_v59, %v660_v57  ;;  %1185 = vrcp.f32 %v806_v58  ;;  %v491_v54 = vadd.f32 %v1571_v56, %v1401_v51  ;;  %v587_v27 = vadd.f32 %v1573_v52, %v1401_v51 }
 0x127   : > { %v1170_v5 = vpop.eup %1169  ;;  %v900_v6 = vmul.f32 %v1168_v61, %v676_v62  ;;  %1187 = vpow2.f32 %v1068_v55  ;;  %v1070_v53 = vmul.f32 -1.442695, %v581_v42  ;;  %vm599_vm6 = vcmp.ge.f32.partialorder %v459_v9, 0.0 }
 0x128   : > { %v1172_v7 = vpop.eup %1171  ;;  %916 = vst [vmem:[%s1457_s17 + $0x38] sm:$0xff] %v884_v23  ;;  %v791_v10 = vadd.f32 1.0, %v1170_v5  ;;  %v647_v22 = vmul.f32 0.01, %v555_v36  ;;  %vm615_vm7 = vcmp.ge.f32.partialorder %v555_v36, 0.0  ;;  %v561_v58 = vadd.f32 %v1508_v29, %v1413_v11 }
 0x129   : > { %932 = vst [vmem:[%s1457_s17 + $0xb8] sm:$0xff] %v900_v6  ;;  %v807_v18 = vadd.f32 1.0, %v1172_v7  ;;  %v1055_v59 = vmul.f32 -1.442695, %v491_v54  ;;  %v1071_v28 = vmul.f32 -1.442695, %v587_v27  ;;  %v663_v60 = vsel %vm599_vm6, %v459_v9, %v631_v43 }
 0x12a   : > { %v1174_v20 = vpop.eup %1173  ;;  %1189 = vrcp.f32 %v791_v10  ;;  %v632_v55 = vmul.f32 0.01, %v465_v44  ;;  %v471_v51 = vadd.f32 %v1523_v45, %v1413_v11  ;;  %v679_v61 = vsel %vm615_vm7, %v555_v36, %v647_v22 }
 0x12b   : > { %v1176_v25 = vpop.eup %1175  ;;  %v885_v31 = vmul.f32 %v1174_v20, %v661_v16  ;;  %1191 = vrcp.f32 %v807_v18  ;;  %vm600_vm8 = vcmp.ge.f32.partialorder %v465_v44, 0.0  ;;  %v567_v29 = vadd.f32 %v1525_v46, %v1413_v11 }
 0x12c   : > { %v1178_v12 = vpop.eup %1177  ;;  %v792_v32 = vadd.f32 1.0, %v1176_v25  ;;  %1193 = vpow2.f32 %v1053_v3  ;;  %v648_v47 = vmul.f32 0.01, %v561_v58  ;;  %v664_v45 = vsel %vm600_vm8, %v465_v44, %v632_v55 }
 0x12d   : > { %v1180_v4 = vpop.eup %1179  ;;  %917 = vst [vmem:[%s1457_s17 + $0x40] sm:$0xff] %v885_v31  ;;  %v901_v38 = vmul.f32 %v1178_v12, %v677_v19  ;;  %1195 = vpow2.f32 %v1069_v21  ;;  %vm616_vm9 = vcmp.ge.f32.partialorder %v561_v58, 0.0  ;;  %v633_v10 = vmul.f32 0.01, %v471_v51 }
 0x12e   : > { %v1182_v40 = vpop.eup %1181  ;;  %v886_v1 = vmul.f32 %v1180_v4, %v662_v14  ;;  %1197 = vrcp.f32 %v792_v32  ;;  %vm601_vm10 = vcmp.ge.f32.partialorder %v471_v51, 0.0  ;;  %v649_v17 = vmul.f32 0.01, %v567_v29 }
 0x12f   : > { %v1184_v35 = vpop.eup %1183  ;;  %933 = vst [vmem:[%s1457_s17 + $0xc0] sm:$0xff] %v901_v38  ;;  %v808_v33 = vadd.f32 1.0, %v1182_v40  ;;  %1199 = vpow2.f32 %v1054_v39  ;;  %v680_v20 = vsel %vm616_vm9, %v561_v58, %v648_v47  ;;  %vm617_vm11 = vcmp.ge.f32.partialorder %v567_v29, 0.0 }
 0x130   : > { %v1186_v49 = vpop.eup %1185  ;;  %918 = vst [vmem:[%s1457_s17 + $0x48] sm:$0xff] %v886_v1  ;;  %v793_v2 = vadd.f32 1.0, %v1184_v35  ;;  %v477_v3 = vadd.f32 %v1533_v63, %v1413_v11  ;;  %v665_v25 = vsel %vm601_vm10, %v471_v51, %v633_v10  ;;  %v573_v31 = vadd.f32 %v1535_v0, %v1413_v11 }
 0x131   : > { %v1188_v37 = vpop.eup %1187  ;;  %v902_v57 = vmul.f32 %v1186_v49, %v678_v41  ;;  %1201 = vrcp.f32 %v808_v33  ;;  %v681_v14 = vsel %vm617_vm11, %v567_v29, %v649_v17  ;;  %v483_v32 = vadd.f32 %v1549_v26, %v1413_v11 }
 0x132   : > { %1203 = vrcp.f32 %v793_v2  ;;  %v809_v34 = vadd.f32 1.0, %v1188_v37  ;;  %v634_v36 = vmul.f32 0.01, %v477_v3  ;;  %vm602_vm12 = vcmp.ge.f32.partialorder %v477_v3, 0.0 }
 0x133   : > { %934 = vst [vmem:[%s1457_s17 + $0xc8] sm:$0xff] %v902_v57  ;;  %1205 = vpow2.f32 %v1070_v53  ;;  %v650_v40 = vmul.f32 0.01, %v573_v31  ;;  %vm618_vm13 = vcmp.ge.f32.partialorder %v573_v31, 0.0  ;;  %v635_v1 = vmul.f32 0.01, %v483_v32 }
 0x134   : > { %v1190_v56 = vpop.eup %1189  ;;  %1207 = vrcp.f32 %v809_v34  ;;  %v579_v42 = vadd.f32 %v1551_v30, %v1413_v11  ;;  %v666_v35 = vsel %vm602_vm12, %v477_v3, %v634_v36  ;;  %vm603_vm14 = vcmp.ge.f32.partialorder %v483_v32, 0.0 }
 0x135   : > { %v1192_v52 = vpop.eup %1191  ;;  %v887_v62 = vmul.f32 %v1190_v56, %v663_v60  ;;  %1209 = vpow2.f32 %v1055_v59  ;;  %v682_v44 = vsel %vm618_vm13, %v573_v31, %v650_v40  ;;  %v489_v49 = vadd.f32 %v1563_v15, %v1413_v11 }
 0x136   : > { %v1194_v23 = vpop.eup %1193  ;;  %v903_v5 = vmul.f32 %v1192_v52, %v679_v61  ;;  %1211 = vpow2.f32 %v1071_v28  ;;  %v585_v53 = vadd.f32 %v1565_v50, %v1413_v11  ;;  %v667_v30 = vsel %vm603_vm14, %v483_v32, %v635_v1 }
 0x137   : > { %v1196_v6 = vpop.eup %1195  ;;  %919 = vst [vmem:[%s1457_s17 + $0x50] sm:$0xff] %v887_v62  ;;  %v794_v7 = vadd.f32 1.0, %v1194_v23  ;;  %v651_v27 = vmul.f32 0.01, %v579_v42  ;;  %vm619_vm15 = vcmp.ge.f32.partialorder %v579_v42, 0.0  ;;  %vm604_vm0 = vcmp.ge.f32.partialorder %v489_v49, 0.0 }
 0x138   : > { %v1198_v8 = vpop.eup %1197  ;;  %935 = vst [vmem:[%s1457_s17 + $0xd0] sm:$0xff] %v903_v5  ;;  %v810_v48 = vadd.f32 1.0, %v1196_v6  ;;  %v636_v57 = vmul.f32 0.01, %v489_v49  ;;  %v652_v22 = vmul.f32 0.01, %v585_v53 }
 0x139   : > { %v1200_v13 = vpop.eup %1199  ;;  %v888_v16 = vmul.f32 %v1198_v8, %v664_v45  ;;  %1213 = vrcp.f32 %v794_v7  ;;  %v683_v15 = vsel %vm619_vm15, %v579_v42, %v651_v27  ;;  %vm620_vm1 = vcmp.ge.f32.partialorder %v585_v53, 0.0 }
 0x13a   : > { %1215 = vrcp.f32 %v810_v48  ;;  %v795_v46 = vadd.f32 1.0, %v1200_v13  ;;  %v668_v11 = vsel %vm604_vm0, %v489_v49, %v636_v57  ;;  %v684_v28 = vsel %vm620_vm1, %v585_v53, %v652_v22 }
 0x13b   : > { %v1202_v18 = vpop.eup %1201  ;;  %920 = vst [vmem:[%s1457_s17 + $0x58] sm:$0xff] %v888_v16 }
 0x13c   : > { %v1204_v21 = vpop.eup %1203  ;;  %v904_v24 = vmul.f32 %v1202_v18, %v680_v20  ;;  %1217 = vrcp.f32 %v795_v46 }
 0x13d   : > { %v1206_v9 = vpop.eup %1205  ;;  %v889_v12 = vmul.f32 %v1204_v21, %v665_v25 }
 0x13e   : > { %v1208_v19 = vpop.eup %1207  ;;  %936 = vst [vmem:[%s1457_s17 + $0xd8] sm:$0xff] %v904_v24  ;;  %v811_v4 = vadd.f32 1.0, %v1206_v9 }
 0x13f   : > { %v1210_v38 = vpop.eup %1209  ;;  %921 = vst [vmem:[%s1457_s17 + $0x60] sm:$0xff] %v889_v12  ;;  %v905_v63 = vmul.f32 %v1208_v19, %v681_v14 }
 0x140   : > { %v1212_v39 = vpop.eup %1211  ;;  %1219 = vrcp.f32 %v811_v4  ;;  %v796_v0 = vadd.f32 1.0, %v1210_v38 }
 0x141   : > { %937 = vst [vmem:[%s1457_s17 + $0xe0] sm:$0xff] %v905_v63  ;;  %v812_v41 = vadd.f32 1.0, %v1212_v39 }
 0x142   : > { %1221 = vrcp.f32 %v796_v0 }
 0x143   : > { %v1214_v26 = vpop.eup %1213  ;;  %1223 = vrcp.f32 %v812_v41 }
 0x144   : > { %v1216_v43 = vpop.eup %1215  ;;  %v890_v33 = vmul.f32 %v1214_v26, %v666_v35 }
 0x145   : > { %v906_v2 = vmul.f32 %v1216_v43, %v682_v44 }
 0x146   : > { %v1218_v54 = vpop.eup %1217  ;;  %922 = vst [vmem:[%s1457_s17 + $0x68] sm:$0xff] %v890_v33 }
 0x147   : > { %938 = vst [vmem:[%s1457_s17 + $0xe8] sm:$0xff] %v906_v2  ;;  %v891_v37 = vmul.f32 %v1218_v54, %v667_v30 }
 0x149   : > { %923 = vst [vmem:[%s1457_s17 + $0x70] sm:$0xff] %v891_v37 }
 0x14a   : > { %v1220_v34 = vpop.eup %1219 }
 0x14b   : > { %v907_v58 = vmul.f32 %v1220_v34, %v683_v15 }
 0x14c   : > { %v1222_v59 = vpop.eup %1221 }
 0x14d   : > { %v1224_v50 = vpop.eup %1223  ;;  %939 = vst [vmem:[%s1457_s17 + $0xf0] sm:$0xff] %v907_v58  ;;  %v892_v56 = vmul.f32 %v1222_v59, %v668_v11 }
 0x14e   : > { %v908_v60 = vmul.f32 %v1224_v50, %v684_v28 }
 0x14f   : > { %924 = vst [vmem:[%s1457_s17 + $0x78] sm:$0xff] %v892_v56 }
 0x150   : > { %940 = vst [vmem:[%s1457_s17 + $0xf8] sm:$0xff] %v908_v60 }
 0x151 PF: > { %s13_s12 = sadd.s32 1, %s1231_s12  }
 0x152   : > { %p10_p4 = scmp.ge.s32.totalorder %s13_s12, 4  }
 0x154   :  { %12 = sbr.rel (!%p10_p4) target bundleno = 1 (0x1), region = 62 }

</bundles_post_ra>
